<compile_context>
chip_gen: v5e
topology: v5e:2x2
jax: 0.10.0
libtpu: 0.0.40
codegen_flags: <defaults>
</compile_context>

<pallas_src>
import jax
import jax.numpy as jnp
from jax.experimental import pallas as pl
from jax.experimental.pallas import tpu as pltpu


def conv_cols_kernel(p_ref, w_ref, b_ref, o_ref):
    """One grid step = CT pixel columns of the whole (N*coil) batch.

    p_ref: (K, CT)     im2col patch columns (K = 9*Cin), lane-dense
    w_ref: (Cout, K)   reshaped conv weight (whole array)
    b_ref: (Cout, 1)   bias
    o_ref: (Cout, CT)  output columns, lane-dense store
    """
    acc = jnp.dot(w_ref[...], p_ref[...], preferred_element_type=jnp.float32)
    o_ref[...] = (acc + b_ref[...]).astype(o_ref.dtype)


def _pick_col_tile(num_cols: int) -> int:
    """Pixel columns per grid step: a multiple of 128 (unmasked stores), big enough to
    amortize per-step overhead, and (when possible) >= 2 grid steps so the parallel
    grid axis can be split across v7x's two TensorCores."""
    max_ct = 8192          # (18 + 4) * 8192 * 4 B * 2 buffers ~= 1.4 MiB of VMEM
    if num_cols <= 128:
        return 128
    if num_cols >= 2 * max_ct:
        return max_ct
    half = (num_cols + 1) // 2
    return ((half + 127) // 128) * 128


def conv2d_3x3_same(x_nhwc, weight, bias):
    """Conv2d(k=3, stride=1, SAME) on a batch of NHWC images via one Pallas matmul."""
    B, H, W, Cin = x_nhwc.shape
    Cout = weight.shape[-1]
    K = 9 * Cin
    P = B * H * W

    # ---- layout plumbing (wrapper): im2col into a transposed, lane-dense slab ----
    # TODO(synk): for large MRI-sized inputs, build the im2col columns inside the
    # kernel from a halo-fetched input block to avoid the 9x HBM read of this slab.
    xp = jnp.pad(x_nhwc, ((0, 0), (1, 1), (1, 1), (0, 0)))
    taps = [xp[:, kh:kh + H, kw:kw + W, :] for kh in range(3) for kw in range(3)]
    patches = jnp.stack(taps, axis=0)                 # (9, B, H, W, Cin)
    patches = jnp.moveaxis(patches, -1, 1)            # (9, Cin, B, H, W)
    patches = patches.reshape(K, P)                   # rows ordered (kh, kw, cin)

    w_t = jnp.transpose(weight, (3, 0, 1, 2)).reshape(Cout, K)   # (Cout, 9*Cin)
    b_t = bias.reshape(Cout, 1)

    ct = _pick_col_tile(P)
    p_pad = pl.cdiv(P, ct) * ct
    if p_pad != P:
        patches = jnp.pad(patches, ((0, 0), (0, p_pad - P)))
    grid = (p_pad // ct,)

    out_t = pl.pallas_call(
        conv_cols_kernel,
        out_shape=jax.ShapeDtypeStruct((Cout, p_pad), x_nhwc.dtype),
        grid_spec=pltpu.PrefetchScalarGridSpec(
            num_scalar_prefetch=0,
            grid=grid,
            in_specs=[
                pl.BlockSpec((K, ct), lambda i: (0, i)),      # patch columns
                pl.BlockSpec((Cout, K), lambda i: (0, 0)),    # whole weight
                pl.BlockSpec((Cout, 1), lambda i: (0, 0)),    # bias
            ],
            out_specs=pl.BlockSpec((Cout, ct), lambda i: (0, i)),
        ),
        compiler_params=pltpu.CompilerParams(
            dimension_semantics=("parallel",)),
    )(patches, w_t, b_t)

    # layout plumbing back: (Cout, B*H*W) -> (B, H, W, Cout)
    out = out_t[:, :P].reshape(Cout, B, H, W)
    return jnp.moveaxis(out, 0, -1)


def multicoil_forward(x, weight, bias, coil_to_batch=True, coil_dim=1):
    """MultiCoil.forward.  x: (N, coil, H, W, Cin) -> (N, coil, H, W, Cout).

    Both coil_to_batch=True and coil_to_batch=False produce identical results for a
    per-image conv model, so both are routed through the same fused (N*coil)-batch
    pallas_call (avoids `coil` separate kernel launches for the per-coil path).
    """
    del coil_to_batch, coil_dim  # same fused computation for both paths
    N, coil, H, W, Cin = x.shape
    xb = x.reshape(N * coil, H, W, Cin)
    y = conv2d_3x3_same(xb, weight, bias)
    return y.reshape(N, coil, H, W, -1)


if __name__ == "__main__":
    # Small deterministic setup: N=2, coil=4, H=W=16, in_channels=2, out_channels=4.
    N, COIL, H, W, CIN, COUT = 2, 4, 16, 16, 2, 4

    key = jax.random.PRNGKey(0)
    x = jax.random.normal(key, (N, COIL, H, W, CIN), dtype=jnp.float32)

    # Deterministic "Conv2d" parameters (shapes from nn.Conv2d(CIN, COUT, 3, padding=1)).
    weight = (jnp.arange(3 * 3 * CIN * COUT, dtype=jnp.float32)
              .reshape(3, 3, CIN, COUT) - (3 * 3 * CIN * COUT) / 2.0) * 0.01  # HWIO
    bias = jnp.arange(COUT, dtype=jnp.float32) * 0.1

    # Pallas-backed MultiCoil forward (both paths).
    out = jax.block_until_ready(
        multicoil_forward(x, weight, bias, coil_to_batch=True))
    out_pc = jax.block_until_ready(
        multicoil_forward(x, weight, bias, coil_to_batch=False))
    assert out.shape == (N, COIL, H, W, COUT)

    # Pure-JAX reference conv for correctness.
    xb = x.reshape(N * COIL, H, W, CIN)
    ref = jax.lax.conv_general_dilated(
        xb, weight, window_strides=(1, 1), padding="SAME",
        dimension_numbers=("NHWC", "HWIO", "NHWC")) + bias
    ref = ref.reshape(N, COIL, H, W, COUT)

    assert jnp.allclose(out, ref, atol=2e-4, rtol=2e-4)
    assert jnp.allclose(out_pc, ref, atol=2e-4, rtol=2e-4)
    print("KERNEL_OK")
</pallas_src>

<mosaic_0001>
module attributes {stable_mosaic.version = 11 : i64} {
  func.func @conv_cols_kernel(%arg0: i32, %arg1: memref<18x1024xf32, #tpu.memory_space<vmem>>, %arg2: memref<4x18xf32, #tpu.memory_space<vmem>>, %arg3: memref<4x1xf32, #tpu.memory_space<vmem>>, %arg4: memref<4x1024xf32, #tpu.memory_space<vmem>>) attributes {dimension_semantics = [#tpu.dimension_semantics<parallel>], iteration_bounds = array<i64: 2>, scalar_prefetch = 0 : i64, scratch_operands = 0 : i64, tpu.core_type = #tpu.core_type<tc>, window_params = [{transform_indices = @transform_0, window_bounds = array<i64: 18, 1024>}, {pipeline_mode = #tpu.pipeline_mode<synchronous>, transform_indices = @transform_1, window_bounds = array<i64: 4, 18>}, {pipeline_mode = #tpu.pipeline_mode<synchronous>, transform_indices = @transform_2, window_bounds = array<i64: 4, 1>}, {transform_indices = @transform_3, window_bounds = array<i64: 4, 1024>}]} {
    %c0 = arith.constant 0 : index
    %c0_0 = arith.constant 0 : index
    %0 = vector.load %arg2[%c0, %c0_0] : memref<4x18xf32, #tpu.memory_space<vmem>>, vector<4x18xf32>
    %c0_1 = arith.constant 0 : index
    %c0_2 = arith.constant 0 : index
    %1 = vector.load %arg1[%c0_1, %c0_2] : memref<18x1024xf32, #tpu.memory_space<vmem>>, vector<18x1024xf32>
    %cst = arith.constant dense<0.000000e+00> : vector<4x1024xf32>
    %2 = tpu.matmul %0, %1, %cst {dimension_numbers = #tpu.dot_dimension_numbers<[1], [0], [0], [1], [0, 0, 1, 1], [], []>} : vector<4x18xf32>, vector<18x1024xf32>, vector<4x1024xf32> -> vector<4x1024xf32>
    %c0_3 = arith.constant 0 : index
    %c0_4 = arith.constant 0 : index
    %3 = vector.load %arg3[%c0_3, %c0_4] : memref<4x1xf32, #tpu.memory_space<vmem>>, vector<4x1xf32>
    %4 = vector.broadcast %3 : vector<4x1xf32> to vector<4x1024xf32>
    %5 = arith.addf %2, %4 : vector<4x1024xf32>
    %c0_5 = arith.constant 0 : index
    %c0_6 = arith.constant 0 : index
    %6 = vector.load %arg4[%c0_5, %c0_6] : memref<4x1024xf32, #tpu.memory_space<vmem>>, vector<4x1024xf32>
    tpu.vector_store %arg4[%c0_5, %c0_6], %5 {strides = array<i32>} : memref<4x1024xf32, #tpu.memory_space<vmem>>, vector<4x1024xf32>,
    return
  }
  func.func @transform_0(%arg0: i32) -> (i32, i32) {
    %c0_i32 = arith.constant 0 : i32
    %c0_i32_0 = arith.constant 0 : i32
    return %c0_i32, %arg0 : i32, i32
  }
  func.func @transform_1(%arg0: i32) -> (i32, i32) {
    %c0_i32 = arith.constant 0 : i32
    %c0_i32_0 = arith.constant 0 : i32
    %c0_i32_1 = arith.constant 0 : i32
    return %c0_i32, %c0_i32_0 : i32, i32
  }
  func.func @transform_2(%arg0: i32) -> (i32, i32) {
    %c0_i32 = arith.constant 0 : i32
    %c0_i32_0 = arith.constant 0 : i32
    %c0_i32_1 = arith.constant 0 : i32
    return %c0_i32, %c0_i32_0 : i32, i32
  }
  func.func @transform_3(%arg0: i32) -> (i32, i32) {
    %c0_i32 = arith.constant 0 : i32
    %c0_i32_0 = arith.constant 0 : i32
    return %c0_i32, %arg0 : i32, i32
  }
}

</mosaic_0001>

<bundles_post_ra>
// kernel: tpu_custom_call.1
= control target key start
LH: loop header
LB: loop body
LE: loop exit
PB: predicated region body
PF: predicated region fallthrough
CT: control target
= control target key end

     0   :  { %8 = vsyncpa [#allocation3], 0  ;;  %s902_s0 = inlined_call_operand.hbm [shape: f32[18,2048], index: 0, kind: input, shape index: {}]   ;;  %s903_s1 = inlined_call_operand.vmem [shape: f32[4,18], index: 1, kind: input, shape index: {}]   ;;  %s904_s2 = inlined_call_operand.vmem [shape: f32[4,1], index: 2, kind: input, shape index: {}]   ;;  %s905_s3 = inlined_call_operand.hbm [shape: f32[4,2048], index: 3, kind: output, shape index: {}]  }
   0x1   :  { %10 = vsyncpa [#allocation3 + $0x1], 0 }
   0x2   :  { %11 = vsyncpa [#allocation4], 0 }
   0x3   :  { %13 = vsyncpa [#allocation4 + $0x1], 0  ;;  %s730_s12 = smov 0   ;;  %s732_s13 = smov 0  }
   0x4   :  { %s734_s14 = smov 0   ;;  %s736_s15 = smov 0  }
   0x5 LB: > { %s751_s16 = sadd.s32 4294967295, %s704_s15   ;;  %s525_s17 = sadd.s32 4294967294, %s704_s15   ;;  %s704_s15 = sphi %s736_s15, %s913_s15   ;;  %s700_s14 = sphi %s734_s14, %s912_s14   ;;  %s696_s13 = sphi %s732_s13, %s911_s13   ;;  %s692_s12 = sphi %s730_s12, %s910_s12  }
   0x6   : > { %s755_s18 = sadd.s32 1, %s704_s15   ;;  %s26_s19 = sadd.s32 1, %s700_s14 }
   0x7   : > { %s23_s20 = ssub.s32 %s704_s15, %s755_s18  ;;  %p33_p0 = scmp.ne.s32.totalorder %s700_s14, %s696_s13 }
   0x8   : > { %p24_p1 = scmp.eq.s32.totalorder %s23_s20, 0  ;;  %p34_p2 = scmp.eq.s32.totalorder %s704_s15, 0 }
   0x9   : > { %p39_p3 = scmp.ne.s32.totalorder %s696_s13, %s692_s12  ;;  %p40_p4 = scmp.eq.s32.totalorder %s751_s16, 0 }
   0xa   : > { %s767_s21 = scalar_select %p24_p1, %s700_s14, %s26_s19  }
   0xb   : > { %p35_p5 = por %p34_p2, %p33_p0  ;;  %p769_p6 = por %p40_p4, %p39_p3 }
   0xc   : > { %p105_p7 = scmp.eq.s32.totalorder %s751_s16, 1  ;;  %p111_p8 = scmp.eq.s32.totalorder %s525_s17, 1 }
   0xd   : > { %p527_p9 = scmp.ge.s32.totalorder %s704_s15, 2  ;;  %p569_p10 = scmp.lt.s32.totalorder %s704_s15, 2 }
   0xe   : > { %p776_p11 = por %p105_p7, %p33_p0  ;;  %p780_p12 = por %p111_p8, %p39_p3 }
   0xf   : > { %s137_s25 = sand.u32 1, %s700_s14   ;;  %s553_s26 = sshll.u32 %s704_s15, 6 }
  0x10   : > { %s555_s27 = smul.u32 192, %s137_s25  ;;  %s146_s30 = scalar_lea.hbm %s902_s0, %s553_s26 }
  0x11   : > { %p789_p13 = pnand %p569_p10, %p35_p5  ;;  %s147_s5 = sshll.u32 %s146_s30, 4  ;;  %s148_s5 = int_to_ptr.hbm [resolvable:$true] %s147_s5 }
  0x12   : > { %s141_s6 = scalar_lea.vmem [#allocation2], %s555_s27  ;;  %p530_p0 = scmp.ge.s32.totalorder %s704_s15, 1 }
  0x13   : > { %s149_s7 = sshll.u32 %s141_s6, 4  ;;  %s138_s8 = scalar_lea.sflag [#allocation3], %s137_s25  ;;  %s150_s7 = int_to_ptr.vmem [resolvable:$true] %s149_s7 }
  0x14   : > { %s608_s9 = sshra.s32 %s148_s5, 4  ;;  %p612_p2 = pneg %p789_p13  ;;  %s609_s9 = int_to_ptr.hbm [resolvable:$true] %s608_s9 }
  0x15   : > { %s610_s10 = scalar_lea.hbm %s609_s9, 192  ;;  %s615_s19 = scalar_lea.hbm %s902_s0, 384 }
  0x16   : > { %p611_p1 = scmp.ne.s32.totalorder %s609_s9, %s610_s10  ;;  %p616_p5 = scmp.lt.s32.totalorder %s609_s9, %s902_s0 }
  0x17   : > { %p617_p7 = scmp.lt.s32.totalorder %s615_s19, %s610_s10 }
  0x18   : > { %p613_p3 = pnand %p612_p2, %p611_p1 }
  0x19   : > { %p618_p8 = por %p617_p7, %p616_p5 }
  0x1a   : > { %p614_p4 = pneg %p613_p3 }
  0x1c   : > { %p619_p10 = pnand %p618_p8, %p614_p4 }
  0x1e   : > { %622 = shalt.err (!%p619_p10)
}
  0x1f   : > { %s706_s25 = smov 2048   ;;  %s707_s27 = smov 1024  }
  0x20   : > { %s708_s28 = smov 64   ;;  %p157_p1 = scmp.lt.s32.totalorder %s704_s15, 3 }
  0x21   : > { %564 = dma.hbm_to_vmem [thread:$0]  (!%p789_p13), %s148_s5, 3072, %s150_s7, %s138_s8, %s706_s25, %s707_s27, %s708_s28  }
  0x22   : > { %p158_p2 = pnand %p530_p0, %p157_p1 }
  0x23   : > { %s808_s29 = sand.u32 (!%p158_p2), 1, %s696_s13  }
  0x24   : > { %161 = sbr.rel (%p158_p2) target bundleno = 197 (0xc5), region = 32  ;;  %s164_s6 = scalar_lea.sflag (!%p158_p2), [#allocation3], %s808_s29 }
  0x25   : > { %s556_s30 = smul.u32 (!%p158_p2), 192, %s808_s29 }
  0x27   : > { %s812_s9 = scalar_lea.vmem (!%p158_p2), [#allocation2], %s556_s30 }
  0x29   : > { %683 = dma.done.wait (%p769_p6), %s164_s6, 3072  }
  0x2a   : > { %685 = vsyncadd (%p769_p6), %s164_s6, 4294964224  ;;  %v709_v0 = vmov 0   ;;  %vm228_vm0 = vcmask 1041408   ;;  %v212_v1 = vld [vmem:[%s812_s9 + $0x90] sm:$0x3]  ;;  %v205_v4 = vld [vmem:[%s812_s9 + $0x58] sm:$0xff] }
  0x2b   : > { %607 = vset.pattern.permute.xlu0 %v709_v0  ;;  %v213_v2 = vld [vmem:[%s812_s9 + $0x98] sm:$0x3]  ;;  %v204_v3 = vld [vmem:[%s812_s9 + $0x50] sm:$0xff]  ;;  %536 = vmatpush.msk.msra.mxu2 %vm228_vm0, %v212_v1  ;;  %v211_v5 = vld [vmem:[%s812_s9 + $0x88] sm:$0x3]  ;;  %vm224_vm1 = vcmask 146432  }
  0x2c   : > { %538 = vmatpush.msk.msra.mxu3 %vm228_vm0, %v213_v2  ;;  %534 = vmatpush.msk.msra.mxu1 %vm228_vm0, %v211_v5  ;;  %v196_v6 = vld [vmem:[%s812_s9 + $0x10] sm:$0xff]  ;;  %v197_v7 = vld [vmem:[%s812_s9 + $0x18] sm:$0xff]  ;;  %v193_v8 = vld [vmem:[%s903_s1] sm:$0xf]  ;;  %s531_s8 = sshll.u32 %s808_s29, 5  ;;  %vm425_vm2 = vcmask 1043456  }
  0x2d   : > { %307 = vmatpush.msra.mxu2 %v204_v3  ;;  %v210_v9 = vld [vmem:[%s812_s9 + $0x80] sm:$0x3]  ;;  %v203_v10 = vld [vmem:[%s812_s9 + $0x48] sm:$0xff]  ;;  %v217_v11 = vld [vmem:[%s812_s9 + $0xb8] sm:$0x3]  ;;  %s190_s10 = scalar_lea.vmem [#allocation5], %s531_s8 }
  0x2e   : > { %327 = vmatpush.msra.mxu3 %v205_v4  ;;  %532 = vmatpush.msk.msra.mxu0 %vm228_vm0, %v210_v9  ;;  %v216_v12 = vld [vmem:[%s812_s9 + $0xb0] sm:$0x3]  ;;  %v202_v13 = vld [vmem:[%s812_s9 + $0x40] sm:$0xff]  ;;  %v195_v14 = vld [vmem:[%s812_s9 + $0x8] sm:$0xff]  ;;  %s554_s11 = sshll.u32 %s751_s16, 5  ;;  %s452_s26 = sshll.u32 %s190_s10, 4  ;;  %s453_s26 = int_to_ptr.vmem [resolvable:$true] %s452_s26 }
  0x2f   : > { %287 = vmatpush.msra.mxu1 %v203_v10  ;;  %308 = vmatpush.msra.mxu2 %v196_v6  ;;  %v209_v15 = vld [vmem:[%s812_s9 + $0x78] sm:$0xff]  ;;  %v194_v16 = vld [vmem:[%s812_s9] sm:$0xff]  ;;  %v208_v17 = vld [vmem:[%s812_s9 + $0x70] sm:$0xff]  ;;  %s450_s20 = scalar_lea.hbm %s905_s3, %s554_s11  ;;  %s439_s16 = scalar_lea.sflag [#allocation4], %s808_s29 }
  0x30   : > { %328 = vmatpush.msra.mxu3 %v197_v7  ;;  %537 = vmatmul.msk.f32.vlgmr.msra.gmra.mxu2 %vm224_vm1, %v193_v8  ;;  %v215_v18 = vld [vmem:[%s812_s9 + $0xa8] sm:$0x3]  ;;  %v201_v19 = vld [vmem:[%s812_s9 + $0x38] sm:$0xff]  ;;  %v200_v20 = vld [vmem:[%s812_s9 + $0x30] sm:$0xff]  ;;  %s454_s25 = sshll.u32 %s450_s20, 4  ;;  %s455_s25 = int_to_ptr.hbm [resolvable:$true] %s454_s25 }
  0x31   : > { %539 = vmatmul.msk.f32.vlgmr.msra.gmra.mxu3 %vm224_vm1, %v193_v8  ;;  %544 = vmatpush.msk.msrb.mxu2 %vm228_vm0, %v216_v12  ;;  %v214_v21 = vld [vmem:[%s812_s9 + $0xa0] sm:$0x3]  ;;  %v207_v22 = vld [vmem:[%s812_s9 + $0x68] sm:$0xff]  ;;  %s652_s27 = sshra.s32 %s455_s25, 4  ;;  %s653_s27 = int_to_ptr.hbm [resolvable:$true] %s652_s27 }
  0x32   : > { %546 = vmatpush.msk.msrb.mxu3 %vm228_vm0, %v217_v11  ;;  %267 = vmatpush.msra.mxu0 %v202_v13  ;;  %v206_v23 = vld [vmem:[%s812_s9 + $0x60] sm:$0xff]  ;;  %v199_v24 = vld [vmem:[%s812_s9 + $0x28] sm:$0xff]  ;;  %s654_s28 = scalar_lea.hbm %s653_s27, 32  ;;  %p659_p3 = scmp.lt.s32.totalorder %s653_s27, %s905_s3 }
  0x33   : > { %288 = vmatpush.msra.mxu1 %v195_v14  ;;  %387 = vmatpush.msrb.mxu2 %v208_v17  ;;  %v218_v25 = vld [vmem:[%s904_s2] sm:$0xf]  ;;  %p655_p6 = scmp.ne.s32.totalorder %s653_s27, %s654_s28 }
  0x34   : > { %407 = vmatpush.msrb.mxu3 %v209_v15  ;;  %535 = vmatmul.msk.f32.vlgmr.msra.gmra.mxu1 %vm224_vm1, %v193_v8  ;;  %v198_v26 = vld [vmem:[%s812_s9 + $0x20] sm:$0xff]  ;;  %s658_s9 = scalar_lea.hbm %s905_s3, 64 }
  0x35   : > { %268 = vmatpush.msra.mxu0 %v194_v16  ;;  %542 = vmatpush.msk.msrb.mxu1 %vm228_vm0, %v215_v18  ;;  %p656_p13 = pnand %p655_p6, %p776_p11  ;;  %p660_p4 = scmp.lt.s32.totalorder %s658_s9, %s654_s28 }
  0x36   : > { %533 = vmatmul.msk.f32.vlgmr.msra.gmra.mxu0 %vm224_vm1, %v193_v8  ;;  %408 = vmatpush.msrb.mxu3 %v201_v19 }
  0x37   : > { %388 = vmatpush.msrb.mxu2 %v200_v20  ;;  %540 = vmatpush.msk.msrb.mxu0 %vm228_vm0, %v214_v21  ;;  %p657_p0 = pneg %p656_p13  ;;  %p661_p5 = por %p660_p4, %p659_p3 }
  0x38   : > { %367 = vmatpush.msrb.mxu1 %v207_v22  ;;  %545 = vmatmul.msk.f32.vlgmr.msrb.gmra.mxu2 %vm224_vm1, %v193_v8 }
  0x39   : > { %547 = vmatmul.msk.f32.vlgmr.msrb.gmra.mxu3 %vm224_vm1, %v193_v8  ;;  %347 = vmatpush.msrb.mxu0 %v206_v23  ;;  %p662_p7 = pnand %p661_p5, %p657_p0 }
  0x3a   : > { %368 = vmatpush.msrb.mxu1 %v199_v24  ;;  %221 = vperm.xlu0 %607, %v218_v25  }
  0x3b   : > { %348 = vmatpush.msrb.mxu0 %v198_v26 }
  0x3c   : > { %543 = vmatmul.msk.f32.vlgmr.msrb.gmra.mxu1 %vm224_vm1, %v193_v8 }
  0x3e   : > { %541 = vmatmul.msk.f32.vlgmr.msrb.gmra.mxu0 %vm224_vm1, %v193_v8 }
  0xac   : > { %v222_v27 = vpop.permute.xlu0 %221 }
  0xb1   : > { %v290_v28 = vpop.f32.mrf.mxu1 }
  0xb2   : > { %v291_v29 = vadd.f32 %v290_v28, %v222_v27 }
  0xb3   : > { %v270_v30 = vpop.f32.mrf.mxu0  ;;  %v310_v33 = vpop.f32.mrf.mxu2 }
  0xb4   : > { %v271_v31 = vadd.f32 %v270_v30, %v222_v27  ;;  %v421_v32 = vrot.slane %v291_v29, 4  ;;  %v330_v34 = vpop.f32.mrf.mxu3  ;;  %v311_v35 = vadd.f32 %v310_v33, %v222_v27 }
  0xb5   : > { %v331_v36 = vadd.f32 %v330_v34, %v222_v27 }
  0xb6   : > { %v426_v37 = vsel %vm425_vm2, %v271_v31, %v421_v32 }
  0xb7   : > { %434 = vst [vmem:[%s190_s10] sm:$0xff] %v426_v37  ;;  %v422_v38 = vrot.slane %v331_v36, 4 }
  0xb9   : > { %v427_v39 = vsel %vm425_vm2, %v311_v35, %v422_v38  ;;  %v370_v40 = vpop.f32.mrf.mxu1 }
  0xba   : > { %435 = vst [vmem:[%s190_s10 + $0x8] sm:$0xff] %v427_v39  ;;  %v371_v41 = vadd.f32 %v370_v40, %v222_v27 }
  0xbb   : > { %v350_v42 = vpop.f32.mrf.mxu0  ;;  %v390_v45 = vpop.f32.mrf.mxu2 }
  0xbc   : > { %v423_v43 = vrot.slane %v371_v41, 4  ;;  %v351_v44 = vadd.f32 %v350_v42, %v222_v27  ;;  %v410_v46 = vpop.f32.mrf.mxu3  ;;  %v391_v49 = vadd.f32 %v390_v45, %v222_v27 }
  0xbd   : > { %v411_v47 = vadd.f32 %v410_v46, %v222_v27 }
  0xbe   : > { %v428_v48 = vsel %vm425_vm2, %v351_v44, %v423_v43 }
  0xbf   : > { %436 = vst [vmem:[%s190_s10 + $0x10] sm:$0xff] %v428_v48  ;;  %v424_v50 = vrot.slane %v411_v47, 4 }
  0xc1   : > { %v429_v51 = vsel %vm425_vm2, %v391_v49, %v424_v50 }
  0xc2   : > { %437 = vst [vmem:[%s190_s10 + $0x18] sm:$0xff] %v429_v51 }
  0xc3   : > { %665 = shalt.err (!%p662_p7)
}
  0xc4   : > { %559 = dma.vmem_to_hbm [thread:$0]  (%p776_p11), %s453_s26, 512, %s455_s25, %s439_s16  }
  0xc5 PF: > { %s466_s29 = sand.u32 1, %s692_s12   ;;  %p566_p8 = pnand %p527_p9, %p780_p12 }
  0xc6   : > { %s467_s5 = scalar_lea.sflag [#allocation4], %s466_s29 }
  0xc7   : > { %p567_p10 = pneg %p566_p8 }
  0xc9   : > { %687 = dma.done.wait (%p567_p10), %s467_s5, 512  }
  0xca   : > { %689 = vsyncadd (%p567_p10), %s467_s5, 4294966784  ;;  %p16_p1 = scmp.ge.s32.totalorder %s755_s18, 4   ;;  %s910_s12 = smov %s696_s13 }
  0xcb   : > { %s911_s13 = smov %s700_s14  ;;  %s912_s14 = smov %s767_s21 }
  0xcc   : > { %s913_s15 = smov %s755_s18  ;;  %18 = sbr.rel (!%p16_p1) target bundleno = 5 (0x5), region = 77 }
  0xd1   :  { %473 = vsyncpa [#allocation3], 1 }
  0xd2   :  { %475 = vsyncpa [#allocation3 + $0x1], 1 }
  0xd3   :  { %476 = vsyncpa [#allocation4], 1 }
  0xd4   :  { %478 = vsyncpa [#allocation4 + $0x1], 1 }

</bundles_post_ra>
